<compile_context>
chip_gen: v7x
topology: tpu7x:2x2x1
jax: 0.10.0
libtpu: 0.0.40
codegen_flags: <defaults>
</compile_context>

<pallas_src>
import jax
import jax.numpy as jnp
from jax.experimental import pallas as pl
from jax.experimental.pallas import tpu as pltpu


def _seqtoemb_kernel(x_ref, w1_ref, b1_ref, w2_ref, b2_ref, o_ref):
    """Fused  relu(x @ W1 + b1) @ W2 + b2  on one (TILE_M, ...) row tile.

    x_ref : (TILE_M, 5)      f32
    w1_ref: (5, 256)         f32
    b1_ref: (1, 256)         f32
    w2_ref: (256, D_PAD)     bf16
    b2_ref: (1, D_PAD)       f32
    o_ref : (TILE_M, D_PAD)  f32
    """
    x = x_ref[...]                       # (TILE_M, 5) f32
    w1 = w1_ref[...]                     # (5, 256)    f32
    # fc_1 on the VPU: 5-term broadcast-FMA (exact f32, keeps the MXU free).
    h = x[:, 0:1] * w1[0:1, :] + b1_ref[...]
    for k in range(1, x.shape[1]):       # static 5-iteration Python loop
        h = h + x[:, k:k + 1] * w1[k:k + 1, :]
    h = jnp.maximum(h, 0.0)
    # TODO(synk): training-mode dropout(p=0.1) would use pltpu.prng_seed /
    # pltpu.stateful_bernoulli; eval-mode dropout is the identity (done here).
    # fc_2 on the MXU in bf16, accumulating in f32.
    o = jnp.dot(h.astype(jnp.bfloat16), w2_ref[...],
                preferred_element_type=jnp.float32) + b2_ref[...]
    o_ref[...] = o.astype(o_ref.dtype)


def _round_up(x, m):
    return (x + m - 1) // m * m


def _pick_tile_m(m, d_pad, hid):
    """Rows per grid step, sized against a VMEM byte budget (v7x-safe)."""
    # Per-row bytes across the pipeline: double-buffered x and out blocks plus
    # the f32 and bf16 copies of the hidden activation as live temporaries.
    per_row = 2 * 5 * 4 + 2 * d_pad * 4 + hid * (4 + 2)
    # Grid-invariant blocks (w1, b1, w2 bf16, b2), counted at 2 buffers each.
    fixed = 2 * (5 * hid * 4 + hid * 4 + hid * d_pad * 2 + d_pad * 4)
    budget = 32 * 1024 * 1024
    tile = max(8, min(2048, (budget - fixed) // per_row))
    tile = tile // 8 * 8
    m8 = _round_up(m, 8)
    if m8 <= tile:
        return m8                             # whole problem in a single step
    if m8 < 2 * tile:
        return _round_up((m8 + 1) // 2, 8)    # >= 2 steps for a 2-TC split
    return tile


@jax.jit
def seq_to_emb(seq, w1, b1, w2, b2):
    """seq: (B, L, 5) f32; w1: (5, 256); b1: (256,); w2: (256, D); b2: (D,).

    Weights use the (in, out) layout; a real PyTorch state_dict Linear weight
    is (out, in) and must be transposed (bias flattened) by the caller.
    """
    B, L, F = seq.shape
    assert F == 5
    HID = w1.shape[1]                    # 256
    D = w2.shape[1]
    M = B * L

    # Pad the output lane dim only when it buys unmasked full-lane stores:
    # keep D as-is when it is small (<128) or already a multiple of 128.
    D_PAD = D if (D < 128 or D % 128 == 0) else _round_up(D, 128)
    TILE_M = _pick_tile_m(M, D_PAD, HID)
    M_PAD = _round_up(M, TILE_M)
    grid_m = M_PAD // TILE_M

    x2d = seq.reshape(M, F)
    if M_PAD != M:
        x2d = jnp.pad(x2d, ((0, M_PAD - M), (0, 0)))
    w2k, b2k = w2, b2.reshape(1, D)
    if D_PAD != D:
        w2k = jnp.pad(w2k, ((0, 0), (0, D_PAD - D)))
        b2k = jnp.pad(b2k, ((0, 0), (0, D_PAD - D)))
    w2k = w2k.astype(jnp.bfloat16)       # MXU-native dtype, halves W2 traffic
    b1k = b1.reshape(1, HID)

    cost = pl.CostEstimate(
        flops=2 * M_PAD * (F * HID + HID * D_PAD),
        transcendentals=0,
        bytes_accessed=(4 * M_PAD * F + 4 * M_PAD * D_PAD
                        + 4 * F * HID + 4 * HID + 2 * HID * D_PAD + 4 * D_PAD),
    )

    out = pl.pallas_call(
        _seqtoemb_kernel,
        out_shape=jax.ShapeDtypeStruct((M_PAD, D_PAD), jnp.float32),
        grid_spec=pltpu.PrefetchScalarGridSpec(
            num_scalar_prefetch=0,
            grid=(grid_m,),
            in_specs=[
                # x tile marches along M with the grid step.
                pl.BlockSpec((TILE_M, F), lambda i: (i, 0)),
                # Weights / biases: constant block index -> VMEM-resident,
                # DMA'd once, never refetched across grid steps.
                pl.BlockSpec((F, HID), lambda i: (0, 0)),
                pl.BlockSpec((1, HID), lambda i: (0, 0)),
                pl.BlockSpec((HID, D_PAD), lambda i: (0, 0)),
                pl.BlockSpec((1, D_PAD), lambda i: (0, 0)),
            ],
            out_specs=pl.BlockSpec((TILE_M, D_PAD), lambda i: (i, 0)),
        ),
        compiler_params=pltpu.CompilerParams(
            # Row tiles are independent -> let Mosaic shard grid steps across
            # TensorCores on 2-TC parts.  TODO(synk): if xprof shows one TC
            # idle on v7x, switch this axis to pltpu.CORE_PARALLEL.
            dimension_semantics=("parallel",),
            vmem_limit_bytes=48 * 1024 * 1024,
        ),
        cost_estimate=cost,
    )(x2d, w1, b1k, w2k, b2k)

    if M_PAD != M or D_PAD != D:
        out = out[:M, :D]
    return out.reshape(B, L, D)


def init_params(key, output_dim):
    """Synthetic params in the (in, out) layout the kernel consumes."""
    k1, k2, k3, k4 = jax.random.split(key, 4)
    w1 = jax.random.normal(k1, (5, 256), jnp.float32) * 0.1
    b1 = jax.random.normal(k2, (256,), jnp.float32) * 0.1
    w2 = jax.random.normal(k3, (256, output_dim), jnp.float32) * 0.1
    b2 = jax.random.normal(k4, (output_dim,), jnp.float32) * 0.1
    return w1, b1, w2, b2


if __name__ == "__main__":
    key = jax.random.PRNGKey(0)
    k_x, k_p = jax.random.split(key)

    B, L, F = 2, 8, 5                    # batch=2, seq=8, pen-feature=5
    seq = jax.random.normal(k_x, (B, L, F), jnp.float32)

    # 32 exercises the small-D masked-store path, 128 the lane-dense pad-free
    # path (the common transformer hidden-size case).
    for output_dim in (32, 128):
        w1, b1, w2, b2 = init_params(jax.random.fold_in(k_p, output_dim),
                                     output_dim)
        out = jax.block_until_ready(seq_to_emb(seq, w1, b1, w2, b2))

        # Reference in plain JAX (eval-mode dropout == identity).  fc_2 runs
        # in bf16 on the MXU, so compare with a bf16-appropriate tolerance.
        ref = (jnp.maximum(seq.reshape(-1, F) @ w1 + b1[None, :], 0.0) @ w2
               + b2[None, :]).reshape(B, L, output_dim)
        assert out.shape == (B, L, output_dim)
        assert jnp.allclose(out, ref, atol=2e-2, rtol=2e-2), (
            "max abs err %.3e" % float(jnp.max(jnp.abs(out - ref))))

    print("KERNEL_OK")
</pallas_src>

<mosaic_0001>
module attributes {stable_mosaic.version = 11 : i64} {
  func.func @_seqtoemb_kernel(%arg0: i32, %arg1: memref<16x5xf32, #tpu.memory_space<vmem>>, %arg2: memref<5x256xf32, #tpu.memory_space<vmem>>, %arg3: memref<1x256xf32, #tpu.memory_space<vmem>>, %arg4: memref<256x32xbf16, #tpu.memory_space<vmem>>, %arg5: memref<1x32xf32, #tpu.memory_space<vmem>>, %arg6: memref<16x32xf32, #tpu.memory_space<vmem>>) attributes {dimension_semantics = [#tpu.dimension_semantics<parallel>], iteration_bounds = array<i64: 1>, scalar_prefetch = 0 : i64, scratch_operands = 0 : i64, tpu.core_type = #tpu.core_type<tc>, window_params = [{transform_indices = @transform_0, window_bounds = array<i64: 16, 5>}, {pipeline_mode = #tpu.pipeline_mode<synchronous>, transform_indices = @transform_1, window_bounds = array<i64: 5, 256>}, {pipeline_mode = #tpu.pipeline_mode<synchronous>, transform_indices = @transform_2, window_bounds = array<i64: 1, 256>}, {pipeline_mode = #tpu.pipeline_mode<synchronous>, transform_indices = @transform_3, window_bounds = array<i64: 256, 32>}, {pipeline_mode = #tpu.pipeline_mode<synchronous>, transform_indices = @transform_4, window_bounds = array<i64: 1, 32>}, {transform_indices = @transform_5, window_bounds = array<i64: 16, 32>}]} {
    %c0 = arith.constant 0 : index
    %c0_0 = arith.constant 0 : index
    %0 = vector.load %arg1[%c0, %c0_0] : memref<16x5xf32, #tpu.memory_space<vmem>>, vector<16x5xf32>
    %c0_1 = arith.constant 0 : index
    %c0_2 = arith.constant 0 : index
    %1 = vector.load %arg2[%c0_1, %c0_2] : memref<5x256xf32, #tpu.memory_space<vmem>>, vector<5x256xf32>
    %2 = vector.extract_strided_slice %0 {offsets = [0, 0], sizes = [16, 1], strides = [1, 1]} : vector<16x5xf32> to vector<16x1xf32>
    %3 = vector.extract_strided_slice %1 {offsets = [0, 0], sizes = [1, 256], strides = [1, 1]} : vector<5x256xf32> to vector<1x256xf32>
    %4 = vector.broadcast %2 : vector<16x1xf32> to vector<16x256xf32>
    %5 = vector.broadcast %3 : vector<1x256xf32> to vector<16x256xf32>
    %6 = arith.mulf %4, %5 : vector<16x256xf32>
    %c0_3 = arith.constant 0 : index
    %c0_4 = arith.constant 0 : index
    %7 = vector.load %arg3[%c0_3, %c0_4] : memref<1x256xf32, #tpu.memory_space<vmem>>, vector<1x256xf32>
    %8 = vector.broadcast %7 : vector<1x256xf32> to vector<16x256xf32>
    %9 = arith.addf %6, %8 : vector<16x256xf32>
    %10 = vector.extract_strided_slice %0 {offsets = [0, 1], sizes = [16, 1], strides = [1, 1]} : vector<16x5xf32> to vector<16x1xf32>
    %11 = vector.extract_strided_slice %1 {offsets = [1, 0], sizes = [1, 256], strides = [1, 1]} : vector<5x256xf32> to vector<1x256xf32>
    %12 = vector.broadcast %10 : vector<16x1xf32> to vector<16x256xf32>
    %13 = vector.broadcast %11 : vector<1x256xf32> to vector<16x256xf32>
    %14 = arith.mulf %12, %13 : vector<16x256xf32>
    %15 = arith.addf %9, %14 : vector<16x256xf32>
    %16 = vector.extract_strided_slice %0 {offsets = [0, 2], sizes = [16, 1], strides = [1, 1]} : vector<16x5xf32> to vector<16x1xf32>
    %17 = vector.extract_strided_slice %1 {offsets = [2, 0], sizes = [1, 256], strides = [1, 1]} : vector<5x256xf32> to vector<1x256xf32>
    %18 = vector.broadcast %16 : vector<16x1xf32> to vector<16x256xf32>
    %19 = vector.broadcast %17 : vector<1x256xf32> to vector<16x256xf32>
    %20 = arith.mulf %18, %19 : vector<16x256xf32>
    %21 = arith.addf %15, %20 : vector<16x256xf32>
    %22 = vector.extract_strided_slice %0 {offsets = [0, 3], sizes = [16, 1], strides = [1, 1]} : vector<16x5xf32> to vector<16x1xf32>
    %23 = vector.extract_strided_slice %1 {offsets = [3, 0], sizes = [1, 256], strides = [1, 1]} : vector<5x256xf32> to vector<1x256xf32>
    %24 = vector.broadcast %22 : vector<16x1xf32> to vector<16x256xf32>
    %25 = vector.broadcast %23 : vector<1x256xf32> to vector<16x256xf32>
    %26 = arith.mulf %24, %25 : vector<16x256xf32>
    %27 = arith.addf %21, %26 : vector<16x256xf32>
    %28 = vector.extract_strided_slice %0 {offsets = [0, 4], sizes = [16, 1], strides = [1, 1]} : vector<16x5xf32> to vector<16x1xf32>
    %29 = vector.extract_strided_slice %1 {offsets = [4, 0], sizes = [1, 256], strides = [1, 1]} : vector<5x256xf32> to vector<1x256xf32>
    %30 = vector.broadcast %28 : vector<16x1xf32> to vector<16x256xf32>
    %31 = vector.broadcast %29 : vector<1x256xf32> to vector<16x256xf32>
    %32 = arith.mulf %30, %31 : vector<16x256xf32>
    %33 = arith.addf %27, %32 : vector<16x256xf32>
    %cst = arith.constant 0.000000e+00 : f32
    %34 = vector.broadcast %cst : f32 to vector<16x256xf32>
    %35 = arith.maximumf %33, %34 : vector<16x256xf32>
    %36 = arith.truncf %35 : vector<16x256xf32> to vector<16x256xbf16>
    %c0_5 = arith.constant 0 : index
    %c0_6 = arith.constant 0 : index
    %37 = vector.load %arg4[%c0_5, %c0_6] : memref<256x32xbf16, #tpu.memory_space<vmem>>, vector<256x32xbf16>
    %cst_7 = arith.constant dense<0.000000e+00> : vector<16x32xf32>
    %38 = tpu.matmul %36, %37, %cst_7 {dimension_numbers = #tpu.dot_dimension_numbers<[1], [0], [0], [1], [0, 0, 1, 1], [], []>} : vector<16x256xbf16>, vector<256x32xbf16>, vector<16x32xf32> -> vector<16x32xf32>
    %c0_8 = arith.constant 0 : index
    %c0_9 = arith.constant 0 : index
    %39 = vector.load %arg5[%c0_8, %c0_9] : memref<1x32xf32, #tpu.memory_space<vmem>>, vector<1x32xf32>
    %40 = vector.broadcast %39 : vector<1x32xf32> to vector<16x32xf32>
    %41 = arith.addf %38, %40 : vector<16x32xf32>
    %c0_10 = arith.constant 0 : index
    %c0_11 = arith.constant 0 : index
    %42 = vector.load %arg6[%c0_10, %c0_11] : memref<16x32xf32, #tpu.memory_space<vmem>>, vector<16x32xf32>
    tpu.vector_store %arg6[%c0_10, %c0_11], %41 {strides = array<i32>} : memref<16x32xf32, #tpu.memory_space<vmem>>, vector<16x32xf32>,
    return
  }
  func.func @transform_0(%arg0: i32) -> (i32, i32) {
    %c0_i32 = arith.constant 0 : i32
    %c0_i32_0 = arith.constant 0 : i32
    return %arg0, %c0_i32 : i32, i32
  }
  func.func @transform_1(%arg0: i32) -> (i32, i32) {
    %c0_i32 = arith.constant 0 : i32
    %c0_i32_0 = arith.constant 0 : i32
    %c0_i32_1 = arith.constant 0 : i32
    return %c0_i32, %c0_i32_0 : i32, i32
  }
  func.func @transform_2(%arg0: i32) -> (i32, i32) {
    %c0_i32 = arith.constant 0 : i32
    %c0_i32_0 = arith.constant 0 : i32
    %c0_i32_1 = arith.constant 0 : i32
    return %c0_i32, %c0_i32_0 : i32, i32
  }
  func.func @transform_3(%arg0: i32) -> (i32, i32) {
    %c0_i32 = arith.constant 0 : i32
    %c0_i32_0 = arith.constant 0 : i32
    %c0_i32_1 = arith.constant 0 : i32
    return %c0_i32, %c0_i32_0 : i32, i32
  }
  func.func @transform_4(%arg0: i32) -> (i32, i32) {
    %c0_i32 = arith.constant 0 : i32
    %c0_i32_0 = arith.constant 0 : i32
    %c0_i32_1 = arith.constant 0 : i32
    return %c0_i32, %c0_i32_0 : i32, i32
  }
  func.func @transform_5(%arg0: i32) -> (i32, i32) {
    %c0_i32 = arith.constant 0 : i32
    %c0_i32_0 = arith.constant 0 : i32
    return %arg0, %c0_i32 : i32, i32
  }
}

</mosaic_0001>

<bundles_post_ra>
// kernel: seq_to_emb.1
= control target key start
LH: loop header
LB: loop body
LE: loop exit
PB: predicated region body
PF: predicated region fallthrough
CT: control target
= control target key end

     0   :  { %v456_v1 = vmov 1   ;;  %v457_v2 = vmov 0   ;;  %v458_v9 = vmov 2   ;;  %v459_v13 = vmov 3   ;;  %s572_s0 = inlined_call_operand.vmem [shape: f32[16,5], index: 0, kind: input, shape index: {}]   ;;  %s573_s1 = inlined_call_operand.vmem [shape: f32[5,256], index: 1, kind: input, shape index: {}]   ;;  %s574_s2 = inlined_call_operand.vmem [shape: f32[1,256], index: 2, kind: input, shape index: {}]   ;;  %s575_s3 = inlined_call_operand.vmem [shape: bf16[256,32], index: 3, kind: input, shape index: {}]   ;;  %s576_s4 = inlined_call_operand.vmem [shape: f32[1,32], index: 4, kind: input, shape index: {}]   ;;  %s577_s5 = inlined_call_operand.hbm [shape: f32[16,32], index: 5, kind: output, shape index: {}]  }
   0x1   :  { %v22_v0 = vld [vmem:[%s572_s0] sm:$0xff]  ;;  %409 = vset.pattern.permute.xlu1 %v456_v1  ;;  %408 = vset.pattern.permute.xlu0 %v457_v2  ;;  %v23_v4 = vld [vmem:[%s572_s0 + $0x8] sm:$0xff]  ;;  %v420_v8 = vld [vmem:[%s575_s3 + $0x50] sm:$0xff]  }
   0x2   :  { %v416_v3 = vld [vmem:[%s575_s3 + $0x40] sm:$0xff]   ;;  %65 = vperm.xlu1 %409, %v22_v0   ;;  %28 = vperm.xlu0 %408, %v22_v0   ;;  %v418_v6 = vld [vmem:[%s575_s3 + $0x48] sm:$0xff]   ;;  %v421_v10 = vld [vmem:[%s575_s3 + $0x10] sm:$0xff]  }
   0x3   :  { %378 = vmatprep.subr.bf16.mxu0 %v416_v3  ;;  %v417_v5 = vld [vmem:[%s575_s3] sm:$0xff]   ;;  %v419_v7 = vld [vmem:[%s575_s3 + $0x8] sm:$0xff]   ;;  %v422_v11 = vld [vmem:[%s575_s3 + $0x58] sm:$0xff]  }
   0x4   :  { %379 = vmatpush3.bf16.msra.mxu0 %v417_v5  ;;  %v423_v12 = vld [vmem:[%s575_s3 + $0x18] sm:$0xff]  }
   0x5   :  { %380 = vmatprep.subr.bf16.mxu0 %v418_v6 }
   0x6   :  { %69 = vperm.xlu1 %409, %v23_v4   ;;  %33 = vperm.xlu0 %408, %v23_v4  }
   0x8   :  { %381 = vmatpush3.bf16.msra.mxu0 %v419_v7 }
   0x9   :  { %382 = vmatprep.subr.bf16.mxu0 %v420_v8 }
   0xa   :  { %411 = vset.pattern.permute.xlu1 %v458_v9  ;;  %410 = vset.pattern.permute.xlu0 %v458_v9 }
   0xb   :  { %93 = vperm.xlu1 %411, %v23_v4   ;;  %89 = vperm.xlu0 %410, %v22_v0  }
   0xc   :  { %383 = vmatpush3.bf16.msra.mxu0 %v421_v10 }
   0xf   :  { %412 = vset.pattern.permute.xlu1 %v459_v13  ;;  %413 = vset.pattern.permute.xlu0 %v459_v13 }
  0x10   :  { %10 = vsyncpa [#allocation3], 0  ;;  %113 = vperm.xlu1 %412, %v22_v0   ;;  %117 = vperm.xlu0 %413, %v23_v4   ;;  %v424_v14 = vld [vmem:[%s575_s3 + $0x60] sm:$0xff]   ;;  %v460_v16 = vmov 4   ;;  %v426_v17 = vld [vmem:[%s575_s3 + $0x68] sm:$0xff]   ;;  %v36_v23 = vlaneseq  ;;  %vm342_vm0 = vcmask 261120  }
  0x11   :  { %384 = vmatprep.subr.bf16.mxu0 %v422_v11  ;;  %v425_v15 = vld [vmem:[%s575_s3 + $0x20] sm:$0xff]   ;;  %v427_v18 = vld [vmem:[%s575_s3 + $0x28] sm:$0xff]   ;;  %v428_v19 = vld [vmem:[%s575_s3 + $0x70] sm:$0xff]   ;;  %s461_s7 = smov [#allocation2]  }
  0x12   :  { %385 = vmatpush3.bf16.msra.mxu0 %v423_v12  ;;  %v429_v20 = vld [vmem:[%s575_s3 + $0x30] sm:$0xff]   ;;  %v430_v21 = vld [vmem:[%s575_s3 + $0x78] sm:$0xff]   ;;  %v37_v24 = vshrl.u32 %v36_v23, 7  ;;  %v24_v28 = vld [vmem:[%s573_s1] sm:$0x1f]  ;;  %s350_s8 = sshll.u32 %s461_s7, 4  ;;  %s351_s8 = int_to_ptr.vmem [resolvable:$true] %s350_s8 }
  0x13   :  { %386 = vmatprep.subr.bf16.mxu0 %v424_v14  ;;  %v431_v22 = vld [vmem:[%s575_s3 + $0x38] sm:$0xff]   ;;  %v25_v29 = vld [vmem:[%s573_s1 + $0x8] sm:$0x1f]  ;;  %v48_v34 = vld [vmem:[%s574_s2] sm:$0x3]  ;;  %s432_s9 = scalar_lea.vmem %s351_s8, 256  ;;  %p437_p1 = scmp.lt.s32.totalorder %s351_s8, %s351_s8 }
  0x14   :  { %414 = vset.pattern.permute.xlu1 %v460_v16  ;;  %415 = vset.pattern.permute.xlu0 %v460_v16  ;;  %v38_v27 = vsub.s32 0, %v37_v24  ;;  %v56_v35 = vsub.s32 1, %v37_v24  ;;  %v98_v36 = vsub.s32 2, %v37_v24  ;;  %v122_v45 = vsub.s32 3, %v37_v24  ;;  %p433_p0 = scmp.ne.s32.totalorder %s351_s8, %s432_s9  ;;  %p438_p2 = scmp.lt.s32.totalorder %s432_s9, %s432_s9 }
  0x15   :  { %137 = vperm.xlu1 %414, %v22_v0   ;;  %v146_v46 = vsub.s32 4, %v37_v24 }
  0x16   :  { %387 = vmatpush3.bf16.msra.mxu0 %v425_v15  ;;  %v39_v32 = vrot.slane %v24_v28, %v38_v27  ;;  %v43_v33 = vrot.slane %v25_v29, %v38_v27  ;;  %v53_v37 = vrot.slane %v48_v34, %v38_v27  ;;  %v57_v41 = vrot.slane %v48_v34, %v56_v35  ;;  %p439_p3 = por %p438_p2, %p437_p1 }
  0x17   :  { %388 = vmatprep.subr.bf16.mxu0 %v426_v17  ;;  %v75_v47 = vrot.slane %v24_v28, %v56_v35  ;;  %v79_v48 = vrot.slane %v25_v29, %v56_v35  ;;  %v99_v49 = vrot.slane %v24_v28, %v98_v36  ;;  %v103_v50 = vrot.slane %v25_v29, %v98_v36 }
  0x18   :  { %v123_v55 = vrot.slane %v24_v28, %v122_v45  ;;  %v127_v56 = vrot.slane %v25_v29, %v122_v45  ;;  %v147_v60 = vrot.slane %v24_v28, %v146_v46  ;;  %v151_v61 = vrot.slane %v25_v29, %v146_v46  ;;  %p440_p4 = pnand %p439_p3, %p433_p0 }
  0x19   :  { %141 = vperm.xlu1 %414, %v23_v4  }
  0x1a   :  { %389 = vmatpush3.bf16.msra.mxu0 %v427_v18 }
  0x1b   :  { %390 = vmatprep.subr.bf16.mxu0 %v428_v19 }
  0x1e   :  { %391 = vmatpush3.bf16.msra.mxu0 %v429_v20 }
  0x1f   :  { %392 = vmatprep.subr.bf16.mxu0 %v430_v21 }
  0x22   :  { %393 = vmatpush3.bf16.msra.mxu0 %v431_v22 }
  0x81   :  { %v66_v25 = vpop.permute.xlu1 %65  ;;  %v29_v26 = vpop.permute.xlu0 %28 }
  0x82   :  { %v44_v42 = vmul.f32 %v39_v32, %v29_v26  ;;  %v45_v43 = vmul.f32 %v43_v33, %v29_v26  ;;  %v80_v62 = vmul.f32 %v75_v47, %v66_v25  ;;  %v81_v63 = vmul.f32 %v79_v48, %v66_v25 }
  0x84   :  { %v60_v53 = vadd.f32 %v53_v37, %v44_v42  ;;  %v61_v54 = vadd.f32 %v57_v41, %v45_v43 }
  0x85   :  { %v70_v30 = vpop.permute.xlu1 %69  ;;  %v34_v31 = vpop.permute.xlu0 %33 }
  0x86   :  { %v46_v38 = vmul.f32 %v39_v32, %v34_v31  ;;  %v47_v39 = vmul.f32 %v43_v33, %v34_v31  ;;  %v82_v58 = vmul.f32 %v75_v47, %v70_v30  ;;  %v83_v59 = vmul.f32 %v79_v48, %v70_v30 }
  0x87   :  { %v84_v7 = vadd.f32 %v80_v62, %v60_v53  ;;  %v85_v8 = vadd.f32 %v81_v63, %v61_v54 }
  0x88   :  { %v62_v51 = vadd.f32 %v53_v37, %v46_v38  ;;  %v63_v52 = vadd.f32 %v57_v41, %v47_v39  ;;  %v361_v38 = vld [vmem:[%s576_s4] ss:$0 sm:$0xff] }
  0x8a   :  { %v94_v40 = vpop.permute.xlu1 %93  ;;  %v90_v44 = vpop.permute.xlu0 %89  ;;  %v86_v3 = vadd.f32 %v82_v58, %v62_v51  ;;  %v87_v4 = vadd.f32 %v83_v59, %v63_v52 }
  0x8b   :  { %v104_v0 = vmul.f32 %v99_v49, %v90_v44  ;;  %v105_v1 = vmul.f32 %v103_v50, %v90_v44  ;;  %v106_v5 = vmul.f32 %v99_v49, %v94_v40  ;;  %v107_v6 = vmul.f32 %v103_v50, %v94_v40 }
  0x8d   :  { %v108_v14 = vadd.f32 %v104_v0, %v84_v7  ;;  %v109_v15 = vadd.f32 %v105_v1, %v85_v8  ;;  %v110_v18 = vadd.f32 %v106_v5, %v86_v3  ;;  %v111_v19 = vadd.f32 %v107_v6, %v87_v4 }
  0x8f   :  { %v114_v57 = vpop.permute.xlu1 %113  ;;  %v118_v2 = vpop.permute.xlu0 %117 }
  0x90   :  { %v128_v9 = vmul.f32 %v123_v55, %v114_v57  ;;  %v129_v10 = vmul.f32 %v127_v56, %v114_v57  ;;  %v130_v11 = vmul.f32 %v123_v55, %v118_v2  ;;  %v131_v12 = vmul.f32 %v127_v56, %v118_v2 }
  0x92   :  { %v132_v20 = vadd.f32 %v128_v9, %v108_v14  ;;  %v133_v21 = vadd.f32 %v129_v10, %v109_v15  ;;  %v134_v22 = vadd.f32 %v130_v11, %v110_v18  ;;  %v135_v23 = vadd.f32 %v131_v12, %v111_v19 }
  0x94   :  { %v138_v13 = vpop.permute.xlu1 %137 }
  0x95   :  { %v152_v16 = vmul.f32 %v147_v60, %v138_v13  ;;  %v153_v17 = vmul.f32 %v151_v61, %v138_v13 }
  0x97   :  { %v156_v25 = vadd.f32 %v152_v16, %v132_v20  ;;  %v157_v28 = vadd.f32 %v153_v17, %v133_v21 }
  0x98   :  { %v142_v24 = vpop.permute.xlu1 %141 }
  0x99   :  { %v154_v26 = vmul.f32 %v147_v60, %v142_v24  ;;  %v155_v27 = vmul.f32 %v151_v61, %v142_v24  ;;  %v160_v31 = vmax.f32 %v156_v25, 0.0  ;;  %v161_v33 = vmax.f32 %v157_v28, 0.0 }
  0x9b   :  { %v158_v29 = vadd.f32 %v154_v26, %v134_v22  ;;  %v159_v30 = vadd.f32 %v155_v27, %v135_v23 }
  0x9d   :  { %v162_v32 = vmax.f32 %v158_v29, 0.0  ;;  %v163_v34 = vmax.f32 %v159_v30, 0.0 }
  0x9f   :  { %v165_v35 = vpack.c.bf16 %v163_v34, %v161_v33  ;;  %v164_v36 = vpack.c.bf16 %v162_v32, %v160_v31 }
  0xa1   :  { %333 = vmatprep.mubr.bf16.mxu0 %v165_v35 }
  0xa2   :  { %334 = vmatmul.mubr.bf16.vlgmr.msra.gmra.mrb[0].mxu0 %v164_v36 }
 0x175   :  { %v394_v37 = vpop.f32.mrb[0].mxu0 }
 0x176   :  { %v395_v39 = vpop.f32.mrb[1].mxu0 }
 0x177   :  { %v396_v40 = vadd.f32 %v395_v39, %v394_v37  ;;  %v397_v41 = vpop.f32.mrb[2].mxu0 }
 0x178   :  { %v398_v42 = vpop.f32.mrb[3].mxu0 }
 0x179   :  { %v336_v43 = vadd.f32 %v396_v40, %v361_v38  ;;  %v399_v44 = vadd.f32 %v398_v42, %v397_v41 }
 0x17b   :  { %343 = vst.msk [vmem:[#allocation2] sm:$0xff] %vm342_vm0, %v336_v43  ;;  %v339_v45 = vadd.f32 %v399_v44, %v361_v38 }
 0x17d   :  { %344 = vst.msk [vmem:[#allocation2 + $0x8] sm:$0xff] %vm342_vm0, %v339_v45 }
 0x17e   :  { %443 = shalt.err (!%p440_p4)
}
 0x17f   :  { %s444_s11 = scalar_lea.hbm %s577_s5, 256 }
 0x180   :  { %p445_p5 = scmp.ne.s32.totalorder %s577_s5, %s444_s11  ;;  %p448_p6 = scmp.lt.u32.totalorder %s444_s11, %s577_s5 }
 0x182   :  { %p450_p7 = pnand %p448_p6, %p445_p5 }
 0x184   :  { %453 = shalt.err (!%p450_p7)
}
 0x185   :  { %s462_s16 = smov 128   ;;  %s463_s17 = smov 8  }
 0x186   :  { %356 = dma.vmem_to_hbm [thread:$0]  %s351_s8, 256, %s577_s5, [#allocation3], %s462_s16, %s462_s16, %s463_s17  }
 0x187   :  { %454 = dma.done.wait [#allocation3], 256  }
 0x188   :  { %455 = vsyncadd [#allocation3], 4294967040 }
 0x189   :  { %360 = vsyncpa [#allocation3], 1 }

</bundles_post_ra>
